<compile_context>
chip_gen: v7x
topology: tpu7x:2x2x1
jax: 0.10.0
libtpu: 0.0.40
codegen_flags: <defaults>
</compile_context>

<pallas_src>
import functools

import jax
import jax.numpy as jnp
import numpy as np
from jax.experimental import pallas as pl
from jax.experimental.pallas import tpu as pltpu

_LANE = 128


def _round_up(a, b):
    return -(-a // b) * b


# --------------------------------- kernel -----------------------------------


def _attention_block_kernel(g_ref, x_ref, wg_ref, wx_ref, bgx_ref, bpsi_ref,
                            out_ref, *, f_g, f_l, f_int, signs, chunk_r):
    """One (batch, spatial-tile) block.

    g_ref:   (1, F_g, tile_r, 128) VMEM
    x_ref:   (1, F_l, tile_r, 128) VMEM
    wg_ref:  (F_g, F_int) SMEM   -- conv+BN weights, scaled by folded psi weight
    wx_ref:  (F_l, F_int) SMEM   -- conv+BN weights, scaled by folded psi weight
    bgx_ref: (F_int,)     SMEM   -- (bias_g + bias_x), scaled by folded psi weight
    bpsi_ref:(1,)         SMEM   -- folded psi bias
    out_ref: (1, F_l, tile_r, 128) VMEM
    signs:   static tuple of bool  -- sign of the original psi weight per channel
    chunk_r: static int            -- sublane rows per inner step
    """
    tile_r = g_ref.shape[2]
    n_chunks = tile_r // chunk_r

    # Hoist every SMEM scalar read out of the chunk loop.
    wg_s = [[wg_ref[i, j] for j in range(f_int)] for i in range(f_g)]
    wx_s = [[wx_ref[i, j] for j in range(f_int)] for i in range(f_l)]
    bgx_s = [bgx_ref[j] for j in range(f_int)]
    bpsi_s = bpsi_ref[0]

    def process_chunk(r0):
        # Per-channel chunk loads; everything below stays in vregs.
        g_ch = [g_ref[0, i, pl.ds(r0, chunk_r), :].astype(jnp.float32)
                for i in range(f_g)]
        x_ch = [x_ref[0, i, pl.ds(r0, chunk_r), :].astype(jnp.float32)
                for i in range(f_l)]

        psi = None
        for j in range(f_int):
            # Scalar bias fused into the first FMA (no jnp.full splat).
            z = g_ch[0] * wg_s[0][j] + bgx_s[j]
            for i in range(1, f_g):
                z = z + g_ch[i] * wg_s[i][j]
            for i in range(f_l):
                z = z + x_ch[i] * wx_s[i][j]
            # wpsi[j] (signed) is folded into the weights above, so
            #   wpsi[j] * relu(w.in + b) == max(z, 0) if wpsi[j] >= 0 else min(z, 0)
            # -> no per-channel vector multiply for the psi projection.
            c = jnp.maximum(z, 0.0) if signs[j] else jnp.minimum(z, 0.0)
            psi = c if psi is None else psi + c

        gate = jax.nn.sigmoid(psi + bpsi_s)          # EUP

        # Per-channel gated stores from already-live values; full 128-lane stores.
        for i in range(f_l):
            out_ref[0, i, pl.ds(r0, chunk_r), :] = (
                x_ch[i] * gate).astype(out_ref.dtype)

    if n_chunks == 1:
        process_chunk(0)
    else:
        def body(c, carry):
            process_chunk(pl.multiple_of(c * chunk_r, chunk_r))
            return carry
        jax.lax.fori_loop(0, n_chunks, body, 0, unroll=min(n_chunks, 8))


# ------------------------------ pallas wrapper -------------------------------


def attention_block_pallas(g4, x4, wg, wx, bgx, bpsi, *, signs, tile_r, chunk_r,
                           vmem_limit_bytes):
    """g4: (N, F_g, S_r, 128), x4: (N, F_l, S_r, 128) -> (N, F_l, S_r, 128)."""
    N, F_g, S_r, L = g4.shape
    _, F_l, _, _ = x4.shape
    F_int = wg.shape[1]
    assert L == _LANE and S_r % tile_r == 0

    kernel = functools.partial(_attention_block_kernel, f_g=F_g, f_l=F_l,
                               f_int=F_int, signs=signs, chunk_r=chunk_r)
    smem = pl.BlockSpec(memory_space=pltpu.MemorySpace.SMEM)
    grid = (N, S_r // tile_r)

    return pl.pallas_call(
        kernel,
        out_shape=jax.ShapeDtypeStruct((N, F_l, S_r, L), x4.dtype),
        grid=grid,
        in_specs=[
            pl.BlockSpec((1, F_g, tile_r, L), lambda n, s: (n, 0, s, 0)),
            pl.BlockSpec((1, F_l, tile_r, L), lambda n, s: (n, 0, s, 0)),
            smem, smem, smem, smem,
        ],
        out_specs=pl.BlockSpec((1, F_l, tile_r, L), lambda n, s: (n, 0, s, 0)),
        compiler_params=pltpu.CompilerParams(
            dimension_semantics=("parallel", "parallel"),
            vmem_limit_bytes=vmem_limit_bytes),
    )(g4, x4, wg, wx, bgx, bpsi)


# ------------------------------ tiling heuristics ----------------------------


def _choose_tiling(n_batch, s_r, f_g, f_l, itemsize, max_tile_rows=1024,
                   vmem_budget_bytes=40 << 20, min_grid_steps=4):
    """Pick (tile_r, s_r_padded): tile_r is a multiple of 8 (or the full extent),
    divides s_r_padded, keeps the double-buffered blocks under the VMEM budget
    (safe for v7x's 64 MiB), and leaves enough grid steps for megacore sharding."""
    per_row_bytes = (f_g + 2 * f_l) * _LANE * itemsize * 2   # g + x + out, x2 bufs
    cap = min(max_tile_rows, max(8, vmem_budget_bytes // per_row_bytes))
    cap -= cap % 8
    if s_r <= cap and (n_batch >= min_grid_steps or s_r < 16):
        return s_r, s_r                                # full extent is always legal
    steps = max(-(-s_r // cap), -(-min_grid_steps // n_batch))
    tile = min(cap, _round_up(max(1, -(-s_r // steps)), 8))
    if tile >= s_r:
        return s_r, s_r
    return tile, _round_up(s_r, tile)


def _pick_chunk_rows(tile_r, n_ch):
    """Rows per inner chunk: keep the live f32 working set within ~40 vregs."""
    if tile_r <= 8:
        return tile_r
    budget_rows = max(8, (40 * 8) // (n_ch + 3))       # 8 rows per f32 vreg
    for c in (64, 32, 16, 8):
        if c <= budget_rows and tile_r % c == 0:
            return c
    return 8 if tile_r % 8 == 0 else tile_r


# ------------------------------ parameter folding ----------------------------


def fold_bn(w, b, gamma, beta, mean, var, eps=1e-5):
    """Fold inference-mode BatchNorm into a 1x1 conv. w: (Cin, Cout), b: (Cout,)."""
    scale = gamma / jnp.sqrt(var + eps)
    return w * scale[None, :], (b - mean) * scale + beta


def fold_attention_params(params, eps=1e-5):
    """Host-side (eager, OUTSIDE jit): fold eval-mode BN into the 1x1 convs and
    fold the signed psi weight into the g/x projections.  Returns (folded dict,
    static per-channel sign tuple)."""
    wg, bg = fold_bn(params["wg"], params["bg_conv"], params["g_gamma"],
                     params["g_beta"], params["g_mean"], params["g_var"], eps)
    wx, bx = fold_bn(params["wx"], params["bx_conv"], params["x_gamma"],
                     params["x_beta"], params["x_mean"], params["x_var"], eps)
    wpsi, bpsi = fold_bn(params["wpsi"], params["bpsi_conv"], params["p_gamma"],
                         params["p_beta"], params["p_mean"], params["p_var"], eps)
    wpsi = wpsi.reshape(-1)                              # (F_int,)
    signs = tuple(bool(s) for s in (np.asarray(wpsi) >= 0.0))   # static
    folded = {
        "wg": wg * wpsi[None, :],
        "wx": wx * wpsi[None, :],
        "bgx": (bg + bx) * wpsi,
        "bpsi": bpsi.reshape(1),
    }
    return folded, signs


# ------------------------------ full forward ---------------------------------


def attention_block_apply(g_nchw, x_nchw, folded, *, signs, max_tile_rows=1024,
                          io_dtype=None):
    """NCHW in -> NCHW out. `io_dtype=jnp.bfloat16` halves HBM traffic (compute
    stays f32 inside the kernel); default keeps the input dtype end to end."""
    N, F_g, H, W = g_nchw.shape
    _, F_l, _, _ = x_nchw.shape
    HW = H * W

    io_dt = np.dtype(io_dtype) if io_dtype is not None else np.dtype(x_nchw.dtype)
    itemsize = io_dt.itemsize

    S_r = -(-HW // _LANE)
    tile_r, S_r_pad = _choose_tiling(N, S_r, F_g, F_l, itemsize,
                                     max_tile_rows=max_tile_rows)
    chunk_r = _pick_chunk_rows(tile_r, F_g + F_l)
    HW_pad = S_r_pad * _LANE

    # NCHW -> (N, C, S_r, 128): metadata reshape (+ spatial zero-pad if needed).
    g3 = g_nchw.astype(io_dt).reshape(N, F_g, HW)
    x3 = x_nchw.astype(io_dt).reshape(N, F_l, HW)
    if HW_pad != HW:
        pad = ((0, 0), (0, 0), (0, HW_pad - HW))
        g3 = jnp.pad(g3, pad)
        x3 = jnp.pad(x3, pad)
    g4 = g3.reshape(N, F_g, S_r_pad, _LANE)
    x4 = x3.reshape(N, F_l, S_r_pad, _LANE)

    blocks_bytes = (F_g + 2 * F_l) * tile_r * _LANE * itemsize * 2
    vmem_limit = int(min(64 << 20, max(32 << 20, blocks_bytes + (4 << 20))))

    out4 = attention_block_pallas(
        g4, x4, folded["wg"], folded["wx"], folded["bgx"], folded["bpsi"],
        signs=signs, tile_r=tile_r, chunk_r=chunk_r,
        vmem_limit_bytes=vmem_limit)

    out = out4.reshape(N, F_l, HW_pad)
    if HW_pad != HW:
        out = out[:, :, :HW]
    return out.reshape(N, F_l, H, W).astype(x_nchw.dtype)


# ------------------------------ pure-JAX reference ---------------------------


def attention_block_ref(g_nchw, x_nchw, params):
    """Pure-JAX reference (same eval-mode BN fold, unfused psi projection)."""
    wg, bg = fold_bn(params["wg"], params["bg_conv"], params["g_gamma"],
                     params["g_beta"], params["g_mean"], params["g_var"])
    wx, bx = fold_bn(params["wx"], params["bx_conv"], params["x_gamma"],
                     params["x_beta"], params["x_mean"], params["x_var"])
    wpsi, bpsi = fold_bn(params["wpsi"], params["bpsi_conv"], params["p_gamma"],
                         params["p_beta"], params["p_mean"], params["p_var"])
    g = jnp.transpose(g_nchw, (0, 2, 3, 1)).astype(jnp.float32)
    x = jnp.transpose(x_nchw, (0, 2, 3, 1)).astype(jnp.float32)
    g1 = jnp.einsum("nhwc,cd->nhwd", g, wg) + bg
    x1 = jnp.einsum("nhwc,cd->nhwd", x, wx) + bx
    r = jnp.maximum(g1 + x1, 0.0)
    psi = jax.nn.sigmoid(jnp.einsum("nhwc,cd->nhwd", r, wpsi) + bpsi)
    return jnp.transpose(x * psi, (0, 3, 1, 2))


def make_params(key, F_g, F_l, F_int):
    ks = jax.random.split(key, 12)
    return {
        # conv weights stored as (Cin, Cout) for 1x1-conv-as-matmul form
        "wg": 0.1 * jax.random.normal(ks[0], (F_g, F_int), jnp.float32),
        "bg_conv": 0.1 * jax.random.normal(ks[1], (F_int,), jnp.float32),
        "wx": 0.1 * jax.random.normal(ks[2], (F_l, F_int), jnp.float32),
        "bx_conv": 0.1 * jax.random.normal(ks[3], (F_int,), jnp.float32),
        "wpsi": 0.1 * jax.random.normal(ks[4], (F_int, 1), jnp.float32),
        "bpsi_conv": 0.1 * jax.random.normal(ks[5], (1,), jnp.float32),
        # BatchNorm params (inference-mode running stats)
        "g_gamma": 1.0 + 0.05 * jax.random.normal(ks[6], (F_int,), jnp.float32),
        "g_beta": 0.05 * jax.random.normal(ks[7], (F_int,), jnp.float32),
        "g_mean": jnp.zeros((F_int,), jnp.float32),
        "g_var": jnp.ones((F_int,), jnp.float32),
        "x_gamma": 1.0 + 0.05 * jax.random.normal(ks[8], (F_int,), jnp.float32),
        "x_beta": 0.05 * jax.random.normal(ks[9], (F_int,), jnp.float32),
        "x_mean": jnp.zeros((F_int,), jnp.float32),
        "x_var": jnp.ones((F_int,), jnp.float32),
        "p_gamma": 1.0 + 0.05 * jax.random.normal(ks[10], (1,), jnp.float32),
        "p_beta": 0.05 * jax.random.normal(ks[11], (1,), jnp.float32),
        "p_mean": jnp.zeros((1,), jnp.float32),
        "p_var": jnp.ones((1,), jnp.float32),
    }


if __name__ == "__main__":
    F_g, F_l, F_int = 4, 4, 8
    N, H, W = 2, 16, 16     # HW = 256 -> 2 spatial rows of 128 lanes per batch

    key = jax.random.PRNGKey(0)
    kg, kx, kp = jax.random.split(key, 3)
    g = jax.random.normal(kg, (N, F_g, H, W), jnp.float32)
    x = jax.random.normal(kx, (N, F_l, H, W), jnp.float32)
    params = make_params(kp, F_g, F_l, F_int)

    # Host-side (eager) folding -> static psi-weight signs baked into the kernel.
    folded, signs = fold_attention_params(params)
    ref = attention_block_ref(g, x, params)

    # f32 datapath (exact-ish vs. reference).
    fwd_f32 = jax.jit(functools.partial(attention_block_apply, signs=signs))
    out = jax.block_until_ready(fwd_f32(g, x, folded))
    assert out.shape == (N, F_l, H, W)
    assert jnp.allclose(out, ref, atol=1e-5, rtol=1e-5), "f32 mismatch vs reference"

    # bf16 I/O datapath (halves HBM traffic; compute stays f32) — looser tolerance.
    fwd_bf16 = jax.jit(functools.partial(attention_block_apply, signs=signs,
                                         io_dtype=jnp.bfloat16))
    out_bf16 = jax.block_until_ready(fwd_bf16(g, x, folded))
    assert jnp.allclose(out_bf16, ref, atol=5e-2, rtol=5e-2), "bf16 mismatch vs reference"

    print("KERNEL_OK")
</pallas_src>

<mosaic_0001>
module attributes {stable_mosaic.version = 11 : i64} {
  func.func @_attention_block_kernel(%arg0: i32, %arg1: i32, %arg2: memref<1x4x2x128xf32, #tpu.memory_space<vmem>>, %arg3: memref<1x4x2x128xf32, #tpu.memory_space<vmem>>, %arg4: memref<4x8xf32, #tpu.memory_space<smem>>, %arg5: memref<4x8xf32, #tpu.memory_space<smem>>, %arg6: memref<8xf32, #tpu.memory_space<smem>>, %arg7: memref<1xf32, #tpu.memory_space<smem>>, %arg8: memref<1x4x2x128xf32, #tpu.memory_space<vmem>>) attributes {dimension_semantics = [#tpu.dimension_semantics<parallel>, #tpu.dimension_semantics<parallel>], iteration_bounds = array<i64: 2, 1>, scalar_prefetch = 0 : i64, scratch_operands = 0 : i64, tpu.core_type = #tpu.core_type<tc>, window_params = [{transform_indices = @transform_0, window_bounds = array<i64: 1, 4, 2, 128>}, {transform_indices = @transform_1, window_bounds = array<i64: 1, 4, 2, 128>}, {transform_indices = @transform_2, window_bounds = array<i64: 4, 8>}, {transform_indices = @transform_3, window_bounds = array<i64: 4, 8>}, {transform_indices = @transform_4, window_bounds = array<i64: 8>}, {transform_indices = @transform_5, window_bounds = array<i64: 1>}, {transform_indices = @transform_6, window_bounds = array<i64: 1, 4, 2, 128>}]} {
    %c0 = arith.constant 0 : index
    %c0_0 = arith.constant 0 : index
    %0 = memref.load %arg4[%c0, %c0_0] : memref<4x8xf32, #tpu.memory_space<smem>>
    %c0_1 = arith.constant 0 : index
    %c1 = arith.constant 1 : index
    %1 = memref.load %arg4[%c0_1, %c1] : memref<4x8xf32, #tpu.memory_space<smem>>
    %c0_2 = arith.constant 0 : index
    %c2 = arith.constant 2 : index
    %2 = memref.load %arg4[%c0_2, %c2] : memref<4x8xf32, #tpu.memory_space<smem>>
    %c0_3 = arith.constant 0 : index
    %c3 = arith.constant 3 : index
    %3 = memref.load %arg4[%c0_3, %c3] : memref<4x8xf32, #tpu.memory_space<smem>>
    %c0_4 = arith.constant 0 : index
    %c4 = arith.constant 4 : index
    %4 = memref.load %arg4[%c0_4, %c4] : memref<4x8xf32, #tpu.memory_space<smem>>
    %c0_5 = arith.constant 0 : index
    %c5 = arith.constant 5 : index
    %5 = memref.load %arg4[%c0_5, %c5] : memref<4x8xf32, #tpu.memory_space<smem>>
    %c0_6 = arith.constant 0 : index
    %c6 = arith.constant 6 : index
    %6 = memref.load %arg4[%c0_6, %c6] : memref<4x8xf32, #tpu.memory_space<smem>>
    %c0_7 = arith.constant 0 : index
    %c7 = arith.constant 7 : index
    %7 = memref.load %arg4[%c0_7, %c7] : memref<4x8xf32, #tpu.memory_space<smem>>
    %c1_8 = arith.constant 1 : index
    %c0_9 = arith.constant 0 : index
    %8 = memref.load %arg4[%c1_8, %c0_9] : memref<4x8xf32, #tpu.memory_space<smem>>
    %c1_10 = arith.constant 1 : index
    %c1_11 = arith.constant 1 : index
    %9 = memref.load %arg4[%c1_10, %c1_11] : memref<4x8xf32, #tpu.memory_space<smem>>
    %c1_12 = arith.constant 1 : index
    %c2_13 = arith.constant 2 : index
    %10 = memref.load %arg4[%c1_12, %c2_13] : memref<4x8xf32, #tpu.memory_space<smem>>
    %c1_14 = arith.constant 1 : index
    %c3_15 = arith.constant 3 : index
    %11 = memref.load %arg4[%c1_14, %c3_15] : memref<4x8xf32, #tpu.memory_space<smem>>
    %c1_16 = arith.constant 1 : index
    %c4_17 = arith.constant 4 : index
    %12 = memref.load %arg4[%c1_16, %c4_17] : memref<4x8xf32, #tpu.memory_space<smem>>
    %c1_18 = arith.constant 1 : index
    %c5_19 = arith.constant 5 : index
    %13 = memref.load %arg4[%c1_18, %c5_19] : memref<4x8xf32, #tpu.memory_space<smem>>
    %c1_20 = arith.constant 1 : index
    %c6_21 = arith.constant 6 : index
    %14 = memref.load %arg4[%c1_20, %c6_21] : memref<4x8xf32, #tpu.memory_space<smem>>
    %c1_22 = arith.constant 1 : index
    %c7_23 = arith.constant 7 : index
    %15 = memref.load %arg4[%c1_22, %c7_23] : memref<4x8xf32, #tpu.memory_space<smem>>
    %c2_24 = arith.constant 2 : index
    %c0_25 = arith.constant 0 : index
    %16 = memref.load %arg4[%c2_24, %c0_25] : memref<4x8xf32, #tpu.memory_space<smem>>
    %c2_26 = arith.constant 2 : index
    %c1_27 = arith.constant 1 : index
    %17 = memref.load %arg4[%c2_26, %c1_27] : memref<4x8xf32, #tpu.memory_space<smem>>
    %c2_28 = arith.constant 2 : index
    %c2_29 = arith.constant 2 : index
    %18 = memref.load %arg4[%c2_28, %c2_29] : memref<4x8xf32, #tpu.memory_space<smem>>
    %c2_30 = arith.constant 2 : index
    %c3_31 = arith.constant 3 : index
    %19 = memref.load %arg4[%c2_30, %c3_31] : memref<4x8xf32, #tpu.memory_space<smem>>
    %c2_32 = arith.constant 2 : index
    %c4_33 = arith.constant 4 : index
    %20 = memref.load %arg4[%c2_32, %c4_33] : memref<4x8xf32, #tpu.memory_space<smem>>
    %c2_34 = arith.constant 2 : index
    %c5_35 = arith.constant 5 : index
    %21 = memref.load %arg4[%c2_34, %c5_35] : memref<4x8xf32, #tpu.memory_space<smem>>
    %c2_36 = arith.constant 2 : index
    %c6_37 = arith.constant 6 : index
    %22 = memref.load %arg4[%c2_36, %c6_37] : memref<4x8xf32, #tpu.memory_space<smem>>
    %c2_38 = arith.constant 2 : index
    %c7_39 = arith.constant 7 : index
    %23 = memref.load %arg4[%c2_38, %c7_39] : memref<4x8xf32, #tpu.memory_space<smem>>
    %c3_40 = arith.constant 3 : index
    %c0_41 = arith.constant 0 : index
    %24 = memref.load %arg4[%c3_40, %c0_41] : memref<4x8xf32, #tpu.memory_space<smem>>
    %c3_42 = arith.constant 3 : index
    %c1_43 = arith.constant 1 : index
    %25 = memref.load %arg4[%c3_42, %c1_43] : memref<4x8xf32, #tpu.memory_space<smem>>
    %c3_44 = arith.constant 3 : index
    %c2_45 = arith.constant 2 : index
    %26 = memref.load %arg4[%c3_44, %c2_45] : memref<4x8xf32, #tpu.memory_space<smem>>
    %c3_46 = arith.constant 3 : index
    %c3_47 = arith.constant 3 : index
    %27 = memref.load %arg4[%c3_46, %c3_47] : memref<4x8xf32, #tpu.memory_space<smem>>
    %c3_48 = arith.constant 3 : index
    %c4_49 = arith.constant 4 : index
    %28 = memref.load %arg4[%c3_48, %c4_49] : memref<4x8xf32, #tpu.memory_space<smem>>
    %c3_50 = arith.constant 3 : index
    %c5_51 = arith.constant 5 : index
    %29 = memref.load %arg4[%c3_50, %c5_51] : memref<4x8xf32, #tpu.memory_space<smem>>
    %c3_52 = arith.constant 3 : index
    %c6_53 = arith.constant 6 : index
    %30 = memref.load %arg4[%c3_52, %c6_53] : memref<4x8xf32, #tpu.memory_space<smem>>
    %c3_54 = arith.constant 3 : index
    %c7_55 = arith.constant 7 : index
    %31 = memref.load %arg4[%c3_54, %c7_55] : memref<4x8xf32, #tpu.memory_space<smem>>
    %c0_56 = arith.constant 0 : index
    %c0_57 = arith.constant 0 : index
    %32 = memref.load %arg5[%c0_56, %c0_57] : memref<4x8xf32, #tpu.memory_space<smem>>
    %c0_58 = arith.constant 0 : index
    %c1_59 = arith.constant 1 : index
    %33 = memref.load %arg5[%c0_58, %c1_59] : memref<4x8xf32, #tpu.memory_space<smem>>
    %c0_60 = arith.constant 0 : index
    %c2_61 = arith.constant 2 : index
    %34 = memref.load %arg5[%c0_60, %c2_61] : memref<4x8xf32, #tpu.memory_space<smem>>
    %c0_62 = arith.constant 0 : index
    %c3_63 = arith.constant 3 : index
    %35 = memref.load %arg5[%c0_62, %c3_63] : memref<4x8xf32, #tpu.memory_space<smem>>
    %c0_64 = arith.constant 0 : index
    %c4_65 = arith.constant 4 : index
    %36 = memref.load %arg5[%c0_64, %c4_65] : memref<4x8xf32, #tpu.memory_space<smem>>
    %c0_66 = arith.constant 0 : index
    %c5_67 = arith.constant 5 : index
    %37 = memref.load %arg5[%c0_66, %c5_67] : memref<4x8xf32, #tpu.memory_space<smem>>
    %c0_68 = arith.constant 0 : index
    %c6_69 = arith.constant 6 : index
    %38 = memref.load %arg5[%c0_68, %c6_69] : memref<4x8xf32, #tpu.memory_space<smem>>
    %c0_70 = arith.constant 0 : index
    %c7_71 = arith.constant 7 : index
    %39 = memref.load %arg5[%c0_70, %c7_71] : memref<4x8xf32, #tpu.memory_space<smem>>
    %c1_72 = arith.constant 1 : index
    %c0_73 = arith.constant 0 : index
    %40 = memref.load %arg5[%c1_72, %c0_73] : memref<4x8xf32, #tpu.memory_space<smem>>
    %c1_74 = arith.constant 1 : index
    %c1_75 = arith.constant 1 : index
    %41 = memref.load %arg5[%c1_74, %c1_75] : memref<4x8xf32, #tpu.memory_space<smem>>
    %c1_76 = arith.constant 1 : index
    %c2_77 = arith.constant 2 : index
    %42 = memref.load %arg5[%c1_76, %c2_77] : memref<4x8xf32, #tpu.memory_space<smem>>
    %c1_78 = arith.constant 1 : index
    %c3_79 = arith.constant 3 : index
    %43 = memref.load %arg5[%c1_78, %c3_79] : memref<4x8xf32, #tpu.memory_space<smem>>
    %c1_80 = arith.constant 1 : index
    %c4_81 = arith.constant 4 : index
    %44 = memref.load %arg5[%c1_80, %c4_81] : memref<4x8xf32, #tpu.memory_space<smem>>
    %c1_82 = arith.constant 1 : index
    %c5_83 = arith.constant 5 : index
    %45 = memref.load %arg5[%c1_82, %c5_83] : memref<4x8xf32, #tpu.memory_space<smem>>
    %c1_84 = arith.constant 1 : index
    %c6_85 = arith.constant 6 : index
    %46 = memref.load %arg5[%c1_84, %c6_85] : memref<4x8xf32, #tpu.memory_space<smem>>
    %c1_86 = arith.constant 1 : index
    %c7_87 = arith.constant 7 : index
    %47 = memref.load %arg5[%c1_86, %c7_87] : memref<4x8xf32, #tpu.memory_space<smem>>
    %c2_88 = arith.constant 2 : index
    %c0_89 = arith.constant 0 : index
    %48 = memref.load %arg5[%c2_88, %c0_89] : memref<4x8xf32, #tpu.memory_space<smem>>
    %c2_90 = arith.constant 2 : index
    %c1_91 = arith.constant 1 : index
    %49 = memref.load %arg5[%c2_90, %c1_91] : memref<4x8xf32, #tpu.memory_space<smem>>
    %c2_92 = arith.constant 2 : index
    %c2_93 = arith.constant 2 : index
    %50 = memref.load %arg5[%c2_92, %c2_93] : memref<4x8xf32, #tpu.memory_space<smem>>
    %c2_94 = arith.constant 2 : index
    %c3_95 = arith.constant 3 : index
    %51 = memref.load %arg5[%c2_94, %c3_95] : memref<4x8xf32, #tpu.memory_space<smem>>
    %c2_96 = arith.constant 2 : index
    %c4_97 = arith.constant 4 : index
    %52 = memref.load %arg5[%c2_96, %c4_97] : memref<4x8xf32, #tpu.memory_space<smem>>
    %c2_98 = arith.constant 2 : index
    %c5_99 = arith.constant 5 : index
    %53 = memref.load %arg5[%c2_98, %c5_99] : memref<4x8xf32, #tpu.memory_space<smem>>
    %c2_100 = arith.constant 2 : index
    %c6_101 = arith.constant 6 : index
    %54 = memref.load %arg5[%c2_100, %c6_101] : memref<4x8xf32, #tpu.memory_space<smem>>
    %c2_102 = arith.constant 2 : index
    %c7_103 = arith.constant 7 : index
    %55 = memref.load %arg5[%c2_102, %c7_103] : memref<4x8xf32, #tpu.memory_space<smem>>
    %c3_104 = arith.constant 3 : index
    %c0_105 = arith.constant 0 : index
    %56 = memref.load %arg5[%c3_104, %c0_105] : memref<4x8xf32, #tpu.memory_space<smem>>
    %c3_106 = arith.constant 3 : index
    %c1_107 = arith.constant 1 : index
    %57 = memref.load %arg5[%c3_106, %c1_107] : memref<4x8xf32, #tpu.memory_space<smem>>
    %c3_108 = arith.constant 3 : index
    %c2_109 = arith.constant 2 : index
    %58 = memref.load %arg5[%c3_108, %c2_109] : memref<4x8xf32, #tpu.memory_space<smem>>
    %c3_110 = arith.constant 3 : index
    %c3_111 = arith.constant 3 : index
    %59 = memref.load %arg5[%c3_110, %c3_111] : memref<4x8xf32, #tpu.memory_space<smem>>
    %c3_112 = arith.constant 3 : index
    %c4_113 = arith.constant 4 : index
    %60 = memref.load %arg5[%c3_112, %c4_113] : memref<4x8xf32, #tpu.memory_space<smem>>
    %c3_114 = arith.constant 3 : index
    %c5_115 = arith.constant 5 : index
    %61 = memref.load %arg5[%c3_114, %c5_115] : memref<4x8xf32, #tpu.memory_space<smem>>
    %c3_116 = arith.constant 3 : index
    %c6_117 = arith.constant 6 : index
    %62 = memref.load %arg5[%c3_116, %c6_117] : memref<4x8xf32, #tpu.memory_space<smem>>
    %c3_118 = arith.constant 3 : index
    %c7_119 = arith.constant 7 : index
    %63 = memref.load %arg5[%c3_118, %c7_119] : memref<4x8xf32, #tpu.memory_space<smem>>
    %c0_120 = arith.constant 0 : index
    %64 = memref.load %arg6[%c0_120] : memref<8xf32, #tpu.memory_space<smem>>
    %c1_121 = arith.constant 1 : index
    %65 = memref.load %arg6[%c1_121] : memref<8xf32, #tpu.memory_space<smem>>
    %c2_122 = arith.constant 2 : index
    %66 = memref.load %arg6[%c2_122] : memref<8xf32, #tpu.memory_space<smem>>
    %c3_123 = arith.constant 3 : index
    %67 = memref.load %arg6[%c3_123] : memref<8xf32, #tpu.memory_space<smem>>
    %c4_124 = arith.constant 4 : index
    %68 = memref.load %arg6[%c4_124] : memref<8xf32, #tpu.memory_space<smem>>
    %c5_125 = arith.constant 5 : index
    %69 = memref.load %arg6[%c5_125] : memref<8xf32, #tpu.memory_space<smem>>
    %c6_126 = arith.constant 6 : index
    %70 = memref.load %arg6[%c6_126] : memref<8xf32, #tpu.memory_space<smem>>
    %c7_127 = arith.constant 7 : index
    %71 = memref.load %arg6[%c7_127] : memref<8xf32, #tpu.memory_space<smem>>
    %c0_128 = arith.constant 0 : index
    %72 = memref.load %arg7[%c0_128] : memref<1xf32, #tpu.memory_space<smem>>
    %c0_129 = arith.constant 0 : index
    %c0_130 = arith.constant 0 : index
    %c0_131 = arith.constant 0 : index
    %c0_132 = arith.constant 0 : index
    %73 = vector.load %arg2[%c0_129, %c0_130, %c0_131, %c0_132] : memref<1x4x2x128xf32, #tpu.memory_space<vmem>>, vector<1x1x2x128xf32>
    %74 = vector.shape_cast %73 : vector<1x1x2x128xf32> to vector<2x128xf32>
    %c0_133 = arith.constant 0 : index
    %c1_134 = arith.constant 1 : index
    %c0_135 = arith.constant 0 : index
    %c0_136 = arith.constant 0 : index
    %75 = vector.load %arg2[%c0_133, %c1_134, %c0_135, %c0_136] : memref<1x4x2x128xf32, #tpu.memory_space<vmem>>, vector<1x1x2x128xf32>
    %76 = vector.shape_cast %75 : vector<1x1x2x128xf32> to vector<2x128xf32>
    %c0_137 = arith.constant 0 : index
    %c2_138 = arith.constant 2 : index
    %c0_139 = arith.constant 0 : index
    %c0_140 = arith.constant 0 : index
    %77 = vector.load %arg2[%c0_137, %c2_138, %c0_139, %c0_140] : memref<1x4x2x128xf32, #tpu.memory_space<vmem>>, vector<1x1x2x128xf32>
    %78 = vector.shape_cast %77 : vector<1x1x2x128xf32> to vector<2x128xf32>
    %c0_141 = arith.constant 0 : index
    %c3_142 = arith.constant 3 : index
    %c0_143 = arith.constant 0 : index
    %c0_144 = arith.constant 0 : index
    %79 = vector.load %arg2[%c0_141, %c3_142, %c0_143, %c0_144] : memref<1x4x2x128xf32, #tpu.memory_space<vmem>>, vector<1x1x2x128xf32>
    %80 = vector.shape_cast %79 : vector<1x1x2x128xf32> to vector<2x128xf32>
    %c0_145 = arith.constant 0 : index
    %c0_146 = arith.constant 0 : index
    %c0_147 = arith.constant 0 : index
    %c0_148 = arith.constant 0 : index
    %81 = vector.load %arg3[%c0_145, %c0_146, %c0_147, %c0_148] : memref<1x4x2x128xf32, #tpu.memory_space<vmem>>, vector<1x1x2x128xf32>
    %82 = vector.shape_cast %81 : vector<1x1x2x128xf32> to vector<2x128xf32>
    %c0_149 = arith.constant 0 : index
    %c1_150 = arith.constant 1 : index
    %c0_151 = arith.constant 0 : index
    %c0_152 = arith.constant 0 : index
    %83 = vector.load %arg3[%c0_149, %c1_150, %c0_151, %c0_152] : memref<1x4x2x128xf32, #tpu.memory_space<vmem>>, vector<1x1x2x128xf32>
    %84 = vector.shape_cast %83 : vector<1x1x2x128xf32> to vector<2x128xf32>
    %c0_153 = arith.constant 0 : index
    %c2_154 = arith.constant 2 : index
    %c0_155 = arith.constant 0 : index
    %c0_156 = arith.constant 0 : index
    %85 = vector.load %arg3[%c0_153, %c2_154, %c0_155, %c0_156] : memref<1x4x2x128xf32, #tpu.memory_space<vmem>>, vector<1x1x2x128xf32>
    %86 = vector.shape_cast %85 : vector<1x1x2x128xf32> to vector<2x128xf32>
    %c0_157 = arith.constant 0 : index
    %c3_158 = arith.constant 3 : index
    %c0_159 = arith.constant 0 : index
    %c0_160 = arith.constant 0 : index
    %87 = vector.load %arg3[%c0_157, %c3_158, %c0_159, %c0_160] : memref<1x4x2x128xf32, #tpu.memory_space<vmem>>, vector<1x1x2x128xf32>
    %88 = vector.shape_cast %87 : vector<1x1x2x128xf32> to vector<2x128xf32>
    %89 = vector.broadcast %0 : f32 to vector<2x128xf32>
    %90 = arith.mulf %74, %89 : vector<2x128xf32>
    %91 = vector.broadcast %64 : f32 to vector<2x128xf32>
    %92 = arith.addf %90, %91 : vector<2x128xf32>
    %93 = vector.broadcast %8 : f32 to vector<2x128xf32>
    %94 = arith.mulf %76, %93 : vector<2x128xf32>
    %95 = arith.addf %92, %94 : vector<2x128xf32>
    %96 = vector.broadcast %16 : f32 to vector<2x128xf32>
    %97 = arith.mulf %78, %96 : vector<2x128xf32>
    %98 = arith.addf %95, %97 : vector<2x128xf32>
    %99 = vector.broadcast %24 : f32 to vector<2x128xf32>
    %100 = arith.mulf %80, %99 : vector<2x128xf32>
    %101 = arith.addf %98, %100 : vector<2x128xf32>
    %102 = vector.broadcast %32 : f32 to vector<2x128xf32>
    %103 = arith.mulf %82, %102 : vector<2x128xf32>
    %104 = arith.addf %101, %103 : vector<2x128xf32>
    %105 = vector.broadcast %40 : f32 to vector<2x128xf32>
    %106 = arith.mulf %84, %105 : vector<2x128xf32>
    %107 = arith.addf %104, %106 : vector<2x128xf32>
    %108 = vector.broadcast %48 : f32 to vector<2x128xf32>
    %109 = arith.mulf %86, %108 : vector<2x128xf32>
    %110 = arith.addf %107, %109 : vector<2x128xf32>
    %111 = vector.broadcast %56 : f32 to vector<2x128xf32>
    %112 = arith.mulf %88, %111 : vector<2x128xf32>
    %113 = arith.addf %110, %112 : vector<2x128xf32>
    %cst = arith.constant 0.000000e+00 : f32
    %114 = vector.broadcast %cst : f32 to vector<2x128xf32>
    %115 = arith.maximumf %113, %114 : vector<2x128xf32>
    %116 = vector.broadcast %1 : f32 to vector<2x128xf32>
    %117 = arith.mulf %74, %116 : vector<2x128xf32>
    %118 = vector.broadcast %65 : f32 to vector<2x128xf32>
    %119 = arith.addf %117, %118 : vector<2x128xf32>
    %120 = vector.broadcast %9 : f32 to vector<2x128xf32>
    %121 = arith.mulf %76, %120 : vector<2x128xf32>
    %122 = arith.addf %119, %121 : vector<2x128xf32>
    %123 = vector.broadcast %17 : f32 to vector<2x128xf32>
    %124 = arith.mulf %78, %123 : vector<2x128xf32>
    %125 = arith.addf %122, %124 : vector<2x128xf32>
    %126 = vector.broadcast %25 : f32 to vector<2x128xf32>
    %127 = arith.mulf %80, %126 : vector<2x128xf32>
    %128 = arith.addf %125, %127 : vector<2x128xf32>
    %129 = vector.broadcast %33 : f32 to vector<2x128xf32>
    %130 = arith.mulf %82, %129 : vector<2x128xf32>
    %131 = arith.addf %128, %130 : vector<2x128xf32>
    %132 = vector.broadcast %41 : f32 to vector<2x128xf32>
    %133 = arith.mulf %84, %132 : vector<2x128xf32>
    %134 = arith.addf %131, %133 : vector<2x128xf32>
    %135 = vector.broadcast %49 : f32 to vector<2x128xf32>
    %136 = arith.mulf %86, %135 : vector<2x128xf32>
    %137 = arith.addf %134, %136 : vector<2x128xf32>
    %138 = vector.broadcast %57 : f32 to vector<2x128xf32>
    %139 = arith.mulf %88, %138 : vector<2x128xf32>
    %140 = arith.addf %137, %139 : vector<2x128xf32>
    %cst_161 = arith.constant 0.000000e+00 : f32
    %141 = vector.broadcast %cst_161 : f32 to vector<2x128xf32>
    %142 = arith.maximumf %140, %141 : vector<2x128xf32>
    %143 = arith.addf %115, %142 : vector<2x128xf32>
    %144 = vector.broadcast %2 : f32 to vector<2x128xf32>
    %145 = arith.mulf %74, %144 : vector<2x128xf32>
    %146 = vector.broadcast %66 : f32 to vector<2x128xf32>
    %147 = arith.addf %145, %146 : vector<2x128xf32>
    %148 = vector.broadcast %10 : f32 to vector<2x128xf32>
    %149 = arith.mulf %76, %148 : vector<2x128xf32>
    %150 = arith.addf %147, %149 : vector<2x128xf32>
    %151 = vector.broadcast %18 : f32 to vector<2x128xf32>
    %152 = arith.mulf %78, %151 : vector<2x128xf32>
    %153 = arith.addf %150, %152 : vector<2x128xf32>
    %154 = vector.broadcast %26 : f32 to vector<2x128xf32>
    %155 = arith.mulf %80, %154 : vector<2x128xf32>
    %156 = arith.addf %153, %155 : vector<2x128xf32>
    %157 = vector.broadcast %34 : f32 to vector<2x128xf32>
    %158 = arith.mulf %82, %157 : vector<2x128xf32>
    %159 = arith.addf %156, %158 : vector<2x128xf32>
    %160 = vector.broadcast %42 : f32 to vector<2x128xf32>
    %161 = arith.mulf %84, %160 : vector<2x128xf32>
    %162 = arith.addf %159, %161 : vector<2x128xf32>
    %163 = vector.broadcast %50 : f32 to vector<2x128xf32>
    %164 = arith.mulf %86, %163 : vector<2x128xf32>
    %165 = arith.addf %162, %164 : vector<2x128xf32>
    %166 = vector.broadcast %58 : f32 to vector<2x128xf32>
    %167 = arith.mulf %88, %166 : vector<2x128xf32>
    %168 = arith.addf %165, %167 : vector<2x128xf32>
    %cst_162 = arith.constant 0.000000e+00 : f32
    %169 = vector.broadcast %cst_162 : f32 to vector<2x128xf32>
    %170 = arith.maximumf %168, %169 : vector<2x128xf32>
    %171 = arith.addf %143, %170 : vector<2x128xf32>
    %172 = vector.broadcast %3 : f32 to vector<2x128xf32>
    %173 = arith.mulf %74, %172 : vector<2x128xf32>
    %174 = vector.broadcast %67 : f32 to vector<2x128xf32>
    %175 = arith.addf %173, %174 : vector<2x128xf32>
    %176 = vector.broadcast %11 : f32 to vector<2x128xf32>
    %177 = arith.mulf %76, %176 : vector<2x128xf32>
    %178 = arith.addf %175, %177 : vector<2x128xf32>
    %179 = vector.broadcast %19 : f32 to vector<2x128xf32>
    %180 = arith.mulf %78, %179 : vector<2x128xf32>
    %181 = arith.addf %178, %180 : vector<2x128xf32>
    %182 = vector.broadcast %27 : f32 to vector<2x128xf32>
    %183 = arith.mulf %80, %182 : vector<2x128xf32>
    %184 = arith.addf %181, %183 : vector<2x128xf32>
    %185 = vector.broadcast %35 : f32 to vector<2x128xf32>
    %186 = arith.mulf %82, %185 : vector<2x128xf32>
    %187 = arith.addf %184, %186 : vector<2x128xf32>
    %188 = vector.broadcast %43 : f32 to vector<2x128xf32>
    %189 = arith.mulf %84, %188 : vector<2x128xf32>
    %190 = arith.addf %187, %189 : vector<2x128xf32>
    %191 = vector.broadcast %51 : f32 to vector<2x128xf32>
    %192 = arith.mulf %86, %191 : vector<2x128xf32>
    %193 = arith.addf %190, %192 : vector<2x128xf32>
    %194 = vector.broadcast %59 : f32 to vector<2x128xf32>
    %195 = arith.mulf %88, %194 : vector<2x128xf32>
    %196 = arith.addf %193, %195 : vector<2x128xf32>
    %cst_163 = arith.constant 0.000000e+00 : f32
    %197 = vector.broadcast %cst_163 : f32 to vector<2x128xf32>
    %198 = arith.maximumf %196, %197 : vector<2x128xf32>
    %199 = arith.addf %171, %198 : vector<2x128xf32>
    %200 = vector.broadcast %4 : f32 to vector<2x128xf32>
    %201 = arith.mulf %74, %200 : vector<2x128xf32>
    %202 = vector.broadcast %68 : f32 to vector<2x128xf32>
    %203 = arith.addf %201, %202 : vector<2x128xf32>
    %204 = vector.broadcast %12 : f32 to vector<2x128xf32>
    %205 = arith.mulf %76, %204 : vector<2x128xf32>
    %206 = arith.addf %203, %205 : vector<2x128xf32>
    %207 = vector.broadcast %20 : f32 to vector<2x128xf32>
    %208 = arith.mulf %78, %207 : vector<2x128xf32>
    %209 = arith.addf %206, %208 : vector<2x128xf32>
    %210 = vector.broadcast %28 : f32 to vector<2x128xf32>
    %211 = arith.mulf %80, %210 : vector<2x128xf32>
    %212 = arith.addf %209, %211 : vector<2x128xf32>
    %213 = vector.broadcast %36 : f32 to vector<2x128xf32>
    %214 = arith.mulf %82, %213 : vector<2x128xf32>
    %215 = arith.addf %212, %214 : vector<2x128xf32>
    %216 = vector.broadcast %44 : f32 to vector<2x128xf32>
    %217 = arith.mulf %84, %216 : vector<2x128xf32>
    %218 = arith.addf %215, %217 : vector<2x128xf32>
    %219 = vector.broadcast %52 : f32 to vector<2x128xf32>
    %220 = arith.mulf %86, %219 : vector<2x128xf32>
    %221 = arith.addf %218, %220 : vector<2x128xf32>
    %222 = vector.broadcast %60 : f32 to vector<2x128xf32>
    %223 = arith.mulf %88, %222 : vector<2x128xf32>
    %224 = arith.addf %221, %223 : vector<2x128xf32>
    %cst_164 = arith.constant 0.000000e+00 : f32
    %225 = vector.broadcast %cst_164 : f32 to vector<2x128xf32>
    %226 = arith.maximumf %224, %225 : vector<2x128xf32>
    %227 = arith.addf %199, %226 : vector<2x128xf32>
    %228 = vector.broadcast %5 : f32 to vector<2x128xf32>
    %229 = arith.mulf %74, %228 : vector<2x128xf32>
    %230 = vector.broadcast %69 : f32 to vector<2x128xf32>
    %231 = arith.addf %229, %230 : vector<2x128xf32>
    %232 = vector.broadcast %13 : f32 to vector<2x128xf32>
    %233 = arith.mulf %76, %232 : vector<2x128xf32>
    %234 = arith.addf %231, %233 : vector<2x128xf32>
    %235 = vector.broadcast %21 : f32 to vector<2x128xf32>
    %236 = arith.mulf %78, %235 : vector<2x128xf32>
    %237 = arith.addf %234, %236 : vector<2x128xf32>
    %238 = vector.broadcast %29 : f32 to vector<2x128xf32>
    %239 = arith.mulf %80, %238 : vector<2x128xf32>
    %240 = arith.addf %237, %239 : vector<2x128xf32>
    %241 = vector.broadcast %37 : f32 to vector<2x128xf32>
    %242 = arith.mulf %82, %241 : vector<2x128xf32>
    %243 = arith.addf %240, %242 : vector<2x128xf32>
    %244 = vector.broadcast %45 : f32 to vector<2x128xf32>
    %245 = arith.mulf %84, %244 : vector<2x128xf32>
    %246 = arith.addf %243, %245 : vector<2x128xf32>
    %247 = vector.broadcast %53 : f32 to vector<2x128xf32>
    %248 = arith.mulf %86, %247 : vector<2x128xf32>
    %249 = arith.addf %246, %248 : vector<2x128xf32>
    %250 = vector.broadcast %61 : f32 to vector<2x128xf32>
    %251 = arith.mulf %88, %250 : vector<2x128xf32>
    %252 = arith.addf %249, %251 : vector<2x128xf32>
    %cst_165 = arith.constant 0.000000e+00 : f32
    %253 = vector.broadcast %cst_165 : f32 to vector<2x128xf32>
    %254 = arith.minimumf %252, %253 : vector<2x128xf32>
    %255 = arith.addf %227, %254 : vector<2x128xf32>
    %256 = vector.broadcast %6 : f32 to vector<2x128xf32>
    %257 = arith.mulf %74, %256 : vector<2x128xf32>
    %258 = vector.broadcast %70 : f32 to vector<2x128xf32>
    %259 = arith.addf %257, %258 : vector<2x128xf32>
    %260 = vector.broadcast %14 : f32 to vector<2x128xf32>
    %261 = arith.mulf %76, %260 : vector<2x128xf32>
    %262 = arith.addf %259, %261 : vector<2x128xf32>
    %263 = vector.broadcast %22 : f32 to vector<2x128xf32>
    %264 = arith.mulf %78, %263 : vector<2x128xf32>
    %265 = arith.addf %262, %264 : vector<2x128xf32>
    %266 = vector.broadcast %30 : f32 to vector<2x128xf32>
    %267 = arith.mulf %80, %266 : vector<2x128xf32>
    %268 = arith.addf %265, %267 : vector<2x128xf32>
    %269 = vector.broadcast %38 : f32 to vector<2x128xf32>
    %270 = arith.mulf %82, %269 : vector<2x128xf32>
    %271 = arith.addf %268, %270 : vector<2x128xf32>
    %272 = vector.broadcast %46 : f32 to vector<2x128xf32>
    %273 = arith.mulf %84, %272 : vector<2x128xf32>
    %274 = arith.addf %271, %273 : vector<2x128xf32>
    %275 = vector.broadcast %54 : f32 to vector<2x128xf32>
    %276 = arith.mulf %86, %275 : vector<2x128xf32>
    %277 = arith.addf %274, %276 : vector<2x128xf32>
    %278 = vector.broadcast %62 : f32 to vector<2x128xf32>
    %279 = arith.mulf %88, %278 : vector<2x128xf32>
    %280 = arith.addf %277, %279 : vector<2x128xf32>
    %cst_166 = arith.constant 0.000000e+00 : f32
    %281 = vector.broadcast %cst_166 : f32 to vector<2x128xf32>
    %282 = arith.maximumf %280, %281 : vector<2x128xf32>
    %283 = arith.addf %255, %282 : vector<2x128xf32>
    %284 = vector.broadcast %7 : f32 to vector<2x128xf32>
    %285 = arith.mulf %74, %284 : vector<2x128xf32>
    %286 = vector.broadcast %71 : f32 to vector<2x128xf32>
    %287 = arith.addf %285, %286 : vector<2x128xf32>
    %288 = vector.broadcast %15 : f32 to vector<2x128xf32>
    %289 = arith.mulf %76, %288 : vector<2x128xf32>
    %290 = arith.addf %287, %289 : vector<2x128xf32>
    %291 = vector.broadcast %23 : f32 to vector<2x128xf32>
    %292 = arith.mulf %78, %291 : vector<2x128xf32>
    %293 = arith.addf %290, %292 : vector<2x128xf32>
    %294 = vector.broadcast %31 : f32 to vector<2x128xf32>
    %295 = arith.mulf %80, %294 : vector<2x128xf32>
    %296 = arith.addf %293, %295 : vector<2x128xf32>
    %297 = vector.broadcast %39 : f32 to vector<2x128xf32>
    %298 = arith.mulf %82, %297 : vector<2x128xf32>
    %299 = arith.addf %296, %298 : vector<2x128xf32>
    %300 = vector.broadcast %47 : f32 to vector<2x128xf32>
    %301 = arith.mulf %84, %300 : vector<2x128xf32>
    %302 = arith.addf %299, %301 : vector<2x128xf32>
    %303 = vector.broadcast %55 : f32 to vector<2x128xf32>
    %304 = arith.mulf %86, %303 : vector<2x128xf32>
    %305 = arith.addf %302, %304 : vector<2x128xf32>
    %306 = vector.broadcast %63 : f32 to vector<2x128xf32>
    %307 = arith.mulf %88, %306 : vector<2x128xf32>
    %308 = arith.addf %305, %307 : vector<2x128xf32>
    %cst_167 = arith.constant 0.000000e+00 : f32
    %309 = vector.broadcast %cst_167 : f32 to vector<2x128xf32>
    %310 = arith.minimumf %308, %309 : vector<2x128xf32>
    %311 = arith.addf %283, %310 : vector<2x128xf32>
    %312 = vector.broadcast %72 : f32 to vector<2x128xf32>
    %313 = arith.addf %311, %312 : vector<2x128xf32>
    %314 = arith.negf %313 : vector<2x128xf32>
    %315 = math.exp %314 : vector<2x128xf32>
    %cst_168 = arith.constant 1.000000e+00 : f32
    %316 = vector.broadcast %cst_168 : f32 to vector<2x128xf32>
    %317 = arith.addf %316, %315 : vector<2x128xf32>
    %318 = arith.divf %316, %317 : vector<2x128xf32>
    %319 = arith.mulf %82, %318 : vector<2x128xf32>
    %c0_169 = arith.constant 0 : index
    %c0_170 = arith.constant 0 : index
    %c0_171 = arith.constant 0 : index
    %c0_172 = arith.constant 0 : index
    %320 = vector.load %arg8[%c0_169, %c0_170, %c0_171, %c0_172] : memref<1x4x2x128xf32, #tpu.memory_space<vmem>>, vector<1x1x2x128xf32>
    %321 = vector.shape_cast %320 : vector<1x1x2x128xf32> to vector<2x128xf32>
    %322 = vector.shape_cast %319 : vector<2x128xf32> to vector<1x1x2x128xf32>
    tpu.vector_store %arg8[%c0_169, %c0_170, %c0_171, %c0_172], %322 {strides = array<i32>} : memref<1x4x2x128xf32, #tpu.memory_space<vmem>>, vector<1x1x2x128xf32>,
    %323 = arith.mulf %84, %318 : vector<2x128xf32>
    %c0_173 = arith.constant 0 : index
    %c1_174 = arith.constant 1 : index
    %c0_175 = arith.constant 0 : index
    %c0_176 = arith.constant 0 : index
    %324 = vector.load %arg8[%c0_173, %c1_174, %c0_175, %c0_176] : memref<1x4x2x128xf32, #tpu.memory_space<vmem>>, vector<1x1x2x128xf32>
    %325 = vector.shape_cast %324 : vector<1x1x2x128xf32> to vector<2x128xf32>
    %326 = vector.shape_cast %323 : vector<2x128xf32> to vector<1x1x2x128xf32>
    tpu.vector_store %arg8[%c0_173, %c1_174, %c0_175, %c0_176], %326 {strides = array<i32>} : memref<1x4x2x128xf32, #tpu.memory_space<vmem>>, vector<1x1x2x128xf32>,
    %327 = arith.mulf %86, %318 : vector<2x128xf32>
    %c0_177 = arith.constant 0 : index
    %c2_178 = arith.constant 2 : index
    %c0_179 = arith.constant 0 : index
    %c0_180 = arith.constant 0 : index
    %328 = vector.load %arg8[%c0_177, %c2_178, %c0_179, %c0_180] : memref<1x4x2x128xf32, #tpu.memory_space<vmem>>, vector<1x1x2x128xf32>
    %329 = vector.shape_cast %328 : vector<1x1x2x128xf32> to vector<2x128xf32>
    %330 = vector.shape_cast %327 : vector<2x128xf32> to vector<1x1x2x128xf32>
    tpu.vector_store %arg8[%c0_177, %c2_178, %c0_179, %c0_180], %330 {strides = array<i32>} : memref<1x4x2x128xf32, #tpu.memory_space<vmem>>, vector<1x1x2x128xf32>,
    %331 = arith.mulf %88, %318 : vector<2x128xf32>
    %c0_181 = arith.constant 0 : index
    %c3_182 = arith.constant 3 : index
    %c0_183 = arith.constant 0 : index
    %c0_184 = arith.constant 0 : index
    %332 = vector.load %arg8[%c0_181, %c3_182, %c0_183, %c0_184] : memref<1x4x2x128xf32, #tpu.memory_space<vmem>>, vector<1x1x2x128xf32>
    %333 = vector.shape_cast %332 : vector<1x1x2x128xf32> to vector<2x128xf32>
    %334 = vector.shape_cast %331 : vector<2x128xf32> to vector<1x1x2x128xf32>
    tpu.vector_store %arg8[%c0_181, %c3_182, %c0_183, %c0_184], %334 {strides = array<i32>} : memref<1x4x2x128xf32, #tpu.memory_space<vmem>>, vector<1x1x2x128xf32>,
    return
  }
  func.func @transform_0(%arg0: i32, %arg1: i32) -> (i32, i32, i32, i32) {
    %c0_i32 = arith.constant 0 : i32
    %c0_i32_0 = arith.constant 0 : i32
    %c0_i32_1 = arith.constant 0 : i32
    return %arg0, %c0_i32, %arg1, %c0_i32_0 : i32, i32, i32, i32
  }
  func.func @transform_1(%arg0: i32, %arg1: i32) -> (i32, i32, i32, i32) {
    %c0_i32 = arith.constant 0 : i32
    %c0_i32_0 = arith.constant 0 : i32
    %c0_i32_1 = arith.constant 0 : i32
    return %arg0, %c0_i32, %arg1, %c0_i32_0 : i32, i32, i32, i32
  }
  func.func @transform_2(%arg0: i32, %arg1: i32) -> (i32, i32) {
    %c0_i32 = arith.constant 0 : i32
    %c0_i32_0 = arith.constant 0 : i32
    %c0_i32_1 = arith.constant 0 : i32
    return %c0_i32, %c0_i32_0 : i32, i32
  }
  func.func @transform_3(%arg0: i32, %arg1: i32) -> (i32, i32) {
    %c0_i32 = arith.constant 0 : i32
    %c0_i32_0 = arith.constant 0 : i32
    %c0_i32_1 = arith.constant 0 : i32
    return %c0_i32, %c0_i32_0 : i32, i32
  }
  func.func @transform_4(%arg0: i32, %arg1: i32) -> i32 {
    %c0_i32 = arith.constant 0 : i32
    %c0_i32_0 = arith.constant 0 : i32
    return %c0_i32 : i32
  }
  func.func @transform_5(%arg0: i32, %arg1: i32) -> i32 {
    %c0_i32 = arith.constant 0 : i32
    %c0_i32_0 = arith.constant 0 : i32
    return %c0_i32 : i32
  }
  func.func @transform_6(%arg0: i32, %arg1: i32) -> (i32, i32, i32, i32) {
    %c0_i32 = arith.constant 0 : i32
    %c0_i32_0 = arith.constant 0 : i32
    %c0_i32_1 = arith.constant 0 : i32
    return %arg0, %c0_i32, %arg1, %c0_i32_0 : i32, i32, i32, i32
  }
}

</mosaic_0001>

<bundles_post_ra>
// kernel: attention_block_apply.1
= control target key start
LH: loop header
LB: loop body
LE: loop exit
PB: predicated region body
PF: predicated region fallthrough
CT: control target
= control target key end

     0   :  { %s1652_s0 = inlined_call_operand.vmem [shape: f32[2,4,2,128], index: 0, kind: input, shape index: {}]   ;;  %s1653_s1 = inlined_call_operand.vmem [shape: f32[2,4,2,128], index: 1, kind: input, shape index: {}]   ;;  %s1654_s2 = inlined_call_operand.vmem [shape: f32[4,8], index: 2, kind: input, shape index: {}]   ;;  %s1655_s3 = inlined_call_operand.vmem [shape: f32[4,8], index: 3, kind: input, shape index: {}]   ;;  %s1656_s4 = inlined_call_operand.vmem [shape: f32[8], index: 4, kind: input, shape index: {}]   ;;  %s1657_s5 = inlined_call_operand.<no memory space> [shape: f32[1], index: 5, kind: input, shape index: {}]   ;;  %s1658_s6 = inlined_call_operand.vmem [shape: f32[2,4,2,128], index: 6, kind: output, shape index: {}]  }
   0x1   :  { %11 = sst [smem:[#allocation2]] %s1657_s5 }
   0x2   :  { %12 = vsyncpa [#allocation4], 0 }
   0x3   :  { %13 = vsyncpa [#allocation6], 0  ;;  %s1086_s23 = smov 0   ;;  %s1088_s24 = smov 0  }
   0x4   :  { %s1090_s25 = smov 0  }
   0x5 LB: > { %s228_s27 = sshll.u32 %s1655_s3, 4  ;;  %s808_s28 = sadd.s32 4294967295, %s1043_s25   ;;  %s1043_s25 = sphi %s1090_s25, %s19_s25   ;;  %s1039_s24 = sphi %s1088_s24, %s1706_s24   ;;  %s1035_s23 = sphi %s1086_s23, %s1705_s23   ;;  %s229_s27 = int_to_ptr.vmem [resolvable:$true] %s228_s27 }
   0x6   : > { %p810_p0 = scmp.ge.s32.totalorder %s1043_s25, 1  ;;  %p204_p1 = scmp.lt.s32.totalorder %s1043_s25, 3 }
   0x7   : > { %p1107_p2 = scmp.eq.s32.totalorder %s808_s28, 0  ;;  %s31_s7 = sadd.s32 1, %s1039_s24 }
   0x8   : > { %p1111_p3 = pnand %p810_p0, %p204_p1  ;;  %s217_s10 = sshll.u32 %s1654_s2, 4  ;;  %s218_s10 = int_to_ptr.vmem [resolvable:$true] %s217_s10 }
   0x9   : > { %s1665_s29 = scalar_select %p1107_p2, 1, 0 }
   0xa   : > { %s1666_s30 = scalar_select %p1111_p3, 1, 0 }
   0xb   : > { %p921_p4 = pneg %p1111_p3  ;;  %p1127_p6 = scmp.ge.s32.totalorder %s31_s7, 2 }
   0xc   : > { %s239_s15 = sshll.u32 %s1656_s4, 4  ;;  %s968_s16 = scalar_lea.vmem %s229_s27, 64  ;;  %s240_s15 = int_to_ptr.vmem [resolvable:$true] %s239_s15 }
   0xd   : > { %p1123_p5 = pnand %p1107_p2, %p921_p4  ;;  %p969_p7 = scmp.ne.s32.totalorder %s229_s27, %s968_s16 }
   0xe   : > { %p976_p11 = scmp.lt.s32.totalorder %s229_s27, %s229_s27  ;;  %p977_p12 = scmp.lt.s32.totalorder %s968_s16, %s968_s16 }
   0xf   : > { %p970_p8 = pneg %p1123_p5 }
  0x10   : > { %p978_p13 = por %p977_p12, %p976_p11 }
  0x11   : > { %p971_p9 = pnand %p970_p8, %p969_p7 }
  0x13   : > { %p972_p10 = pneg %p971_p9 }
  0x15   : > { %p979_p0 = pnand %p978_p13, %p972_p10 }
  0x17   : > { %982 = shalt.err (!%p979_p0)
}
  0x18   : > { %s1045_s17 = smov [#allocation5]   ;;  %s1708_s7 = smov (%p1127_p6, %s31_s7), 0 }
  0x19   : > { %927 = dma.vmem_to_smem (!%p1123_p5), %s229_s27, 64, %s1045_s17, [#allocation6]  }
  0x1a   : > { %s983_s18 = scalar_lea.vmem %s218_s10, 64  ;;  %p991_p9 = scmp.lt.s32.totalorder %s218_s10, %s218_s10 }
  0x1b   : > { %p984_p1 = scmp.ne.s32.totalorder %s218_s10, %s983_s18  ;;  %p992_p2 = scmp.lt.s32.totalorder %s983_s18, %s983_s18 }
  0x1d   : > { %p986_p4 = pnand %p984_p1, %p970_p8  ;;  %p993_p11 = por %p992_p2, %p991_p9 }
  0x1f   : > { %p987_p7 = pneg %p986_p4 }
  0x21   : > { %p994_p10 = pnand %p993_p11, %p987_p7 }
  0x23   : > { %997 = shalt.err (!%p994_p10)
}
  0x24   : > { %s1046_s19 = smov [#allocation3]   ;;  %s998_s20 = scalar_lea.vmem %s240_s15, 16 }
  0x25   : > { %924 = dma.vmem_to_smem (!%p1123_p5), %s218_s10, 64, %s1046_s19, [#allocation4]  }
  0x26   : > { %p999_p6 = scmp.ne.s32.totalorder %s240_s15, %s998_s20  ;;  %p1006_p0 = scmp.lt.s32.totalorder %s240_s15, %s240_s15 }
  0x27   : > { %p1007_p1 = scmp.lt.s32.totalorder %s998_s20, %s998_s20 }
  0x28   : > { %p1001_p12 = pnand %p999_p6, %p970_p8 }
  0x29   : > { %p1008_p4 = por %p1007_p1, %p1006_p0 }
  0x2a   : > { %p1002_p13 = pneg %p1001_p12 }
  0x2c   : > { %p1009_p3 = pnand %p1008_p4, %p1002_p13 }
  0x2e   : > { %1012 = shalt.err (!%p1009_p3)
}
  0x2f   : > { %s1047_s21 = smov [#allocation7]   ;;  %p1669_p2 = scmp.ne.s32.totalorder %s1666_s30, 0 }
  0x30   : > { %930 = dma.vmem_to_smem (!%p1123_p5), %s240_s15, 16, %s1047_s21, [#allocation6]  }
  0x31   : > { %277 = sbr.rel (%p1669_p2) target bundleno = 169 (0xa9), region = 44 }
  0x38   : > { %p1670_p7 = scmp.ne.s32.totalorder %s1665_s29, 0 }
  0x3a   : > { %1026 = dma.done.wait (%p1670_p7), [#allocation4], 64  }
  0x3b   : > { %1028 = vsyncadd (%p1670_p7), [#allocation4], 4294967232 }
  0x3c   : > { %1030 = dma.done.wait (%p1670_p7), [#allocation6], 80  }
  0x3d   : > { %1032 = vsyncadd (%p1670_p7), [#allocation6], 4294967216 }
  0x3e   : > { %291 = sfence }
  0x3f   : > { %p330_p3 = scmp.lt.s32.totalorder %s1035_s23, 1  ;;  %s1166_s22 = sld [smem:[#allocation3]] }
  0x40   : > { %s1168_s5 = sld [smem:[#allocation3 + $0x1]]  ;;  %s1170_s26 = sld [smem:[#allocation3 + $0x2]] }
  0x41   : > { %s1710_s23 = smov (!%p330_p3, %s1035_s23), 1  ;;  %s1173_s27 = sld [smem:[#allocation3 + $0x3]] }
  0x42   : > { %s1175_s28 = sld [smem:[#allocation3 + $0x4]]  ;;  %s1177_s29 = sshll.u32 %s1710_s23, 3 }
  0x43   : > { %s1179_s30 = sld [smem:[#allocation3 + $0x5]]  ;;  %s1185_s10 = scalar_lea.vmem %s1652_s0, %s1177_s29 }
  0x44   : > { %s1191_s13 = scalar_lea.vmem %s1653_s1, %s1177_s29  ;;  %s1193_s14 = sld [smem:[#allocation3 + $0x6]]  ;;  %v427_v0 = vld [vmem:[%s1185_s10] sm:$0x3]  ;;  %v894_v7 = vld [vmem:[%s1185_s10 + $0x2] sm:$0x3] }
  0x45   : > { %s1195_s23 = sld [smem:[#allocation3 + $0x7]]  ;;  %s1197_s15 = sld [smem:[#allocation3 + $0x80]]  ;;  %v441_v1 = vstv %s1166_s22  ;;  %v895_v24 = vld [vmem:[%s1185_s10 + $0x4] sm:$0x3]  ;;  %v896_v41 = vld [vmem:[%s1185_s10 + $0x6] sm:$0x3] }
  0x46   : > { %s1199_s16 = sld [smem:[#allocation3 + $0x81]]  ;;  %s1201_s17 = sld [smem:[#allocation3 + $0x82]]  ;;  %v467_v2 = vstv %s1168_s5  ;;  %v494_v3 = vstv %s1170_s26  ;;  %v1227_v8 = vmul.f32 %v441_v1, %v427_v0  ;;  %v1351_v58 = vld [vmem:[%s1191_s13] sm:$0x3] }
  0x47   : > { %s1203_s18 = sld [smem:[#allocation3 + $0x83]]  ;;  %s1205_s19 = sld [smem:[#allocation3 + $0x84]]  ;;  %v521_v4 = vstv %s1173_s27  ;;  %v1229_v9 = vmul.f32 %v467_v2, %v427_v0  ;;  %v1231_v10 = vmul.f32 %v494_v3, %v427_v0  ;;  %1671 = vst [vmem:[#allocation10_spill] sm:$0xff] %v1351_v58 }
  0x48   : > { %s1211_s20 = sld [smem:[#allocation3 + $0x85]]  ;;  %s1213_s21 = sld [smem:[#allocation3 + $0x86]]  ;;  %v548_v5 = vstv %s1175_s28  ;;  %v1239_v13 = vmul.f32 %v521_v4, %v427_v0 }
  0x49   : > { %s1217_s8 = sld [smem:[#allocation3 + $0x87]]  ;;  %s1219_s9 = sld [smem:[#allocation3 + $0x100]]  ;;  %v575_v6 = vstv %s1179_s30  ;;  %v1241_v14 = vmul.f32 %v548_v5, %v427_v0 }
  0x4a   : > { %s1222_s11 = sld [smem:[#allocation3 + $0x101]]  ;;  %s1224_s22 = sld [smem:[#allocation3 + $0x102]]  ;;  %v602_v11 = vstv %s1193_s14  ;;  %v1250_v18 = vmul.f32 %v575_v6, %v427_v0 }
  0x4b   : > { %s1234_s5 = sld [smem:[#allocation3 + $0x103]]  ;;  %s1236_s26 = sld [smem:[#allocation3 + $0x104]]  ;;  %v445_v12 = vstv %s1197_s15  ;;  %v629_v15 = vstv %s1195_s23  ;;  %v1252_v19 = vmul.f32 %v602_v11, %v427_v0 }
  0x4c   : > { %s1244_s27 = sld [smem:[#allocation3 + $0x105]]  ;;  %s1246_s28 = sld [smem:[#allocation3 + $0x106]]  ;;  %v471_v16 = vstv %s1199_s16  ;;  %v498_v17 = vstv %s1201_s17  ;;  %v1258_v20 = vmul.f32 %v894_v7, %v445_v12  ;;  %v1262_v23 = vmul.f32 %v629_v15, %v427_v0 }
  0x4d   : > { %s1254_s30 = sld [smem:[#allocation3 + $0x107]]  ;;  %s1256_s12 = sld [smem:[#allocation3 + $0x180]]  ;;  %v525_v21 = vstv %s1203_s18  ;;  %v552_v22 = vstv %s1205_s19  ;;  %v1269_v25 = vmul.f32 %v894_v7, %v471_v16  ;;  %v1271_v26 = vmul.f32 %v894_v7, %v498_v17  ;;  %v1395_v16 = vld [vmem:[%s1191_s13 + $0x2] sm:$0x3] }
  0x4e   : > { %s1264_s14 = sld [smem:[#allocation3 + $0x181]]  ;;  %s1266_s23 = sld [smem:[#allocation3 + $0x182]]  ;;  %v579_v27 = vstv %s1211_s20  ;;  %v606_v28 = vstv %s1213_s21  ;;  %v1280_v30 = vmul.f32 %v894_v7, %v525_v21  ;;  %v1282_v31 = vmul.f32 %v894_v7, %v552_v22  ;;  %1672 = vst [vmem:[#allocation11_spill] sm:$0xff] %v1395_v16 }
  0x4f   : > { %s1275_s15 = sld [smem:[#allocation3 + $0x183]]  ;;  %s1277_s16 = sld [smem:[#allocation3 + $0x184]]  ;;  %v448_v29 = vstv %s1219_s9  ;;  %v633_v32 = vstv %s1217_s8  ;;  %v1291_v35 = vmul.f32 %v894_v7, %v579_v27  ;;  %v1293_v36 = vmul.f32 %v894_v7, %v606_v28 }
  0x50   : > { %s1285_s17 = sld [smem:[#allocation3 + $0x185]]  ;;  %s1287_s18 = sld [smem:[#allocation3 + $0x186]]  ;;  %v474_v33 = vstv %s1222_s11  ;;  %v501_v34 = vstv %s1224_s22  ;;  %v1299_v37 = vmul.f32 %v895_v24, %v448_v29  ;;  %v1303_v40 = vmul.f32 %v894_v7, %v633_v32 }
  0x51   : > { %s1295_s19 = sld [smem:[#allocation3 + $0x187]]  ;;  %s1297_s20 = sld [smem:[#allocation5]]  ;;  %v528_v38 = vstv %s1234_s5  ;;  %v555_v39 = vstv %s1236_s26  ;;  %v1310_v42 = vmul.f32 %v895_v24, %v474_v33  ;;  %v1312_v43 = vmul.f32 %v895_v24, %v501_v34 }
  0x52   : > { %s1305_s21 = sld [smem:[#allocation5 + $0x1]]  ;;  %s1307_s8 = sld [smem:[#allocation5 + $0x2]]  ;;  %v582_v44 = vstv %s1244_s27  ;;  %v609_v45 = vstv %s1246_s28  ;;  %v1321_v47 = vmul.f32 %v895_v24, %v528_v38  ;;  %v1323_v48 = vmul.f32 %v895_v24, %v555_v39 }
  0x53   : > { %s1316_s9 = sld [smem:[#allocation5 + $0x3]]  ;;  %s1318_s11 = sld [smem:[#allocation5 + $0x4]]  ;;  %v451_v46 = vstv %s1256_s12  ;;  %v636_v49 = vstv %s1254_s30  ;;  %v1332_v52 = vmul.f32 %v895_v24, %v582_v44  ;;  %v1334_v53 = vmul.f32 %v895_v24, %v609_v45 }
  0x54   : > { %s1326_s10 = sld [smem:[#allocation5 + $0x5]]  ;;  %s1328_s22 = sld [smem:[#allocation5 + $0x6]]  ;;  %v477_v50 = vstv %s1264_s14  ;;  %v504_v51 = vstv %s1266_s23  ;;  %v1340_v54 = vmul.f32 %v896_v41, %v451_v46  ;;  %v1344_v57 = vmul.f32 %v895_v24, %v636_v49  ;;  %v1446_v49 = vld [vmem:[%s1191_s13 + $0x4] sm:$0x3] }
  0x55   : > { %s1336_s5 = sld [smem:[#allocation5 + $0x7]]  ;;  %s1338_s26 = sld [smem:[#allocation5 + $0x80]]  ;;  %v531_v55 = vstv %s1275_s15  ;;  %v558_v56 = vstv %s1277_s16  ;;  %v1353_v59 = vmul.f32 %v896_v41, %v477_v50  ;;  %v1355_v60 = vmul.f32 %v896_v41, %v504_v51  ;;  %1674 = vst [vmem:[#allocation13_spill] sm:$0xff] %v1446_v49 }
  0x56   : > { %s1346_s27 = sld [smem:[#allocation5 + $0x81]]  ;;  %s1348_s28 = sld [smem:[#allocation5 + $0x82]]  ;;  %v585_v61 = vstv %s1285_s17  ;;  %v612_v62 = vstv %s1287_s18  ;;  %v1364_v0 = vmul.f32 %v896_v41, %v531_v55  ;;  %v1366_v1 = vmul.f32 %v896_v41, %v558_v56 }
  0x57   : > { %s1359_s30 = sld [smem:[#allocation5 + $0x83]]  ;;  %s1361_s12 = sld [smem:[#allocation5 + $0x84]]  ;;  %v454_v63 = vstv %s1297_s20  ;;  %v639_v2 = vstv %s1295_s19  ;;  %v1375_v5 = vmul.f32 %v896_v41, %v585_v61  ;;  %v1377_v6 = vmul.f32 %v896_v41, %v612_v62 }
  0x58   : > { %s1369_s14 = sld [smem:[#allocation5 + $0x85]]  ;;  %s1371_s23 = sld [smem:[#allocation5 + $0x86]]  ;;  %v480_v3 = vstv %s1305_s21  ;;  %v507_v4 = vstv %s1307_s8  ;;  %v1384_v7 = vmul.f32 %v454_v63, %v1351_v58  ;;  %v1388_v15 = vmul.f32 %v896_v41, %v639_v2 }
  0x59   : > { %s1379_s15 = sld [smem:[#allocation5 + $0x87]]  ;;  %s1381_s16 = sld [smem:[#allocation5 + $0x100]]  ;;  %v534_v11 = vstv %s1316_s9  ;;  %v561_v12 = vstv %s1318_s11  ;;  %v1398_v17 = vmul.f32 %v480_v3, %v1351_v58  ;;  %v1401_v21 = vmul.f32 %v507_v4, %v1351_v58 }
  0x5a   : > { %s1390_s17 = sld [smem:[#allocation5 + $0x101]]  ;;  %s1392_s18 = sld [smem:[#allocation5 + $0x102]]  ;;  %v588_v22 = vstv %s1326_s10  ;;  %v615_v24 = vstv %s1328_s22  ;;  %v1411_v28 = vmul.f32 %v534_v11, %v1351_v58  ;;  %v1414_v29 = vmul.f32 %v561_v12, %v1351_v58 }
  0x5b   : > { %s1405_s19 = sld [smem:[#allocation5 + $0x103]]  ;;  %s1407_s20 = sld [smem:[#allocation5 + $0x104]]  ;;  %v457_v27 = vstv %s1338_s26  ;;  %v642_v32 = vstv %s1336_s5  ;;  %v1424_v38 = vmul.f32 %v588_v22, %v1351_v58  ;;  %v1427_v39 = vmul.f32 %v615_v24, %v1351_v58 }
  0x5c   : > { %s1417_s21 = sld [smem:[#allocation5 + $0x105]]  ;;  %s1419_s8 = sld [smem:[#allocation5 + $0x106]]  ;;  %v483_v33 = vstv %s1346_s27  ;;  %v510_v34 = vstv %s1348_s28  ;;  %v1434_v41 = vmul.f32 %v1395_v16, %v457_v27  ;;  %v1439_v46 = vmul.f32 %v642_v32, %v1351_v58 }
  0x5d   : > { %s1429_s9 = sld [smem:[#allocation5 + $0x107]]  ;;  %s1431_s11 = sld [smem:[#allocation5 + $0x180]]  ;;  %v537_v44 = vstv %s1359_s30  ;;  %v564_v45 = vstv %s1361_s12  ;;  %v1449_v50 = vmul.f32 %v1395_v16, %v483_v33  ;;  %v1452_v51 = vmul.f32 %v1395_v16, %v510_v34  ;;  %v1497_v33 = vld [vmem:[%s1191_s13 + $0x6] sm:$0x3] }
  0x5e   : > { %1673 = vst [vmem:[#allocation12_spill] sm:$0xff] %v1439_v46  ;;  %s1441_s10 = sld [smem:[#allocation5 + $0x181]]  ;;  %s1443_s22 = sld [smem:[#allocation5 + $0x182]]  ;;  %v591_v55 = vstv %s1369_s14  ;;  %v618_v56 = vstv %s1371_s23  ;;  %v1462_v62 = vmul.f32 %v1395_v16, %v537_v44  ;;  %v1465_v63 = vmul.f32 %v1395_v16, %v564_v45 }
  0x5f   : > { %s1456_s5 = sld [smem:[#allocation5 + $0x183]]  ;;  %s1458_s26 = sld [smem:[#allocation5 + $0x184]]  ;;  %v460_v61 = vstv %s1381_s16  ;;  %v645_v2 = vstv %s1379_s15  ;;  %v1475_v11 = vmul.f32 %v1395_v16, %v591_v55  ;;  %v1478_v12 = vmul.f32 %v1395_v16, %v618_v56 }
  0x60   : > { %s1468_s27 = sld [smem:[#allocation5 + $0x185]]  ;;  %s1470_s28 = sld [smem:[#allocation5 + $0x186]]  ;;  %v486_v3 = vstv %s1390_s17  ;;  %v513_v4 = vstv %s1392_s18  ;;  %v1485_v22 = vmul.f32 %v1446_v49, %v460_v61  ;;  %v1490_v32 = vmul.f32 %v1395_v16, %v645_v2 }
  0x61   : > { %1675 = vst [vmem:[#allocation14_spill] sm:$0xff] %v1478_v12  ;;  %s1480_s30 = sld [smem:[#allocation5 + $0x187]]  ;;  %s1482_s12 = sld [smem:[#allocation7]]  ;;  %v540_v24 = vstv %s1405_s19  ;;  %v567_v27 = vstv %s1407_s20  ;;  %v1500_v34 = vmul.f32 %v1446_v49, %v486_v3  ;;  %v1503_v44 = vmul.f32 %v1446_v49, %v513_v4 }
  0x62   : > { %1676 = vst [vmem:[#allocation15_spill] sm:$0xff] %v1490_v32  ;;  %s1492_s14 = sld [smem:[#allocation7 + $0x1]]  ;;  %s1494_s23 = sld [smem:[#allocation7 + $0x2]]  ;;  %v594_v45 = vstv %s1417_s21  ;;  %v621_v55 = vstv %s1419_s8  ;;  %v1513_v61 = vmul.f32 %v1446_v49, %v540_v24  ;;  %v1516_v2 = vmul.f32 %v1446_v49, %v567_v27 }
  0x63   : > { %s1507_s15 = sld [smem:[#allocation7 + $0x3]]  ;;  %s1509_s16 = sld [smem:[#allocation7 + $0x4]]  ;;  %v463_v56 = vstv %s1431_s11  ;;  %v648_v3 = vstv %s1429_s9  ;;  %v1526_v58 = vmul.f32 %v1446_v49, %v594_v45  ;;  %v1529_v24 = vmul.f32 %v1446_v49, %v621_v55 }
  0x64   : > { %1677 = vst [vmem:[#allocation16_spill] sm:$0xff] %v1513_v61  ;;  %1678 = vst [vmem:[#allocation17_spill] sm:$0xff] %v1516_v2  ;;  %s1519_s13 = sld [smem:[#allocation7 + $0x5]]  ;;  %s1521_s17 = sld [smem:[#allocation7 + $0x6]]  ;;  %v489_v4 = vstv %s1441_s10  ;;  %v516_v16 = vstv %s1443_s22  ;;  %v1534_v27 = vmul.f32 %v1497_v33, %v463_v56  ;;  %v1539_v12 = vmul.f32 %v1446_v49, %v648_v3 }
  0x65   : > { %1679 = vst [vmem:[#allocation18_spill] sm:$0xff] %v1526_v58  ;;  %1680 = vst [vmem:[#allocation19_spill] sm:$0xff] %v1529_v24  ;;  %s1531_s18 = sld [smem:[#allocation7 + $0x7]]  ;;  %v543_v32 = vstv %s1456_s5  ;;  %v570_v46 = vstv %s1458_s26  ;;  %v1542_v45 = vmul.f32 %v1497_v33, %v489_v4  ;;  %v1545_v55 = vmul.f32 %v1497_v33, %v516_v16  ;;  %s426_s19 = sld [smem:[#allocation2]] }
  0x66   : > { %1681 = vst [vmem:[#allocation20_spill] sm:$0xff] %v1539_v12  ;;  %v1548_v24 = vmul.f32 %v1497_v33, %v543_v32  ;;  %v597_v58 = vstv %s1468_s27  ;;  %v1553_v2 = vmul.f32 %v1497_v33, %v570_v46  ;;  %s353_s8 = scalar_lea.vmem %s1658_s6, %s1177_s29 }
  0x67   : > { %1682 = vst [vmem:[#allocation21_spill] sm:$0xff] %v1542_v45  ;;  %1683 = vst [vmem:[#allocation22_spill] sm:$0xff] %v1545_v55  ;;  %v443_v56 = vstv %s1482_s12  ;;  %v1556_v61 = vmul.f32 %v1497_v33, %v597_v58 }
  0x68   : > { %1684 = vst [vmem:[#allocation23_spill] sm:$0xff] %v1548_v24  ;;  %1685 = vst [vmem:[#allocation24_spill] sm:$0xff] %v1553_v2  ;;  %v444_v4 = vadd.f32 %v443_v56, %v1227_v8  ;;  %v469_v49 = vstv %s1492_s14  ;;  %v496_v12 = vstv %s1494_s23 }
  0x69   : > { %1686 = vst [vmem:[#allocation25_spill] sm:$0xff] %v1556_v61  ;;  %v470_v55 = vadd.f32 %v469_v49, %v1229_v9  ;;  %v497_v32 = vadd.f32 %v496_v12, %v1231_v10  ;;  %v523_v24 = vstv %s1507_s15  ;;  %v550_v45 = vstv %s1509_s16 }
  0x6a   : > { %v447_v46 = vadd.f32 %v1258_v20, %v444_v4  ;;  %v524_v2 = vadd.f32 %v523_v24, %v1239_v13  ;;  %v551_v58 = vadd.f32 %v550_v45, %v1241_v14  ;;  %v577_v3 = vstv %s1519_s13 }
  0x6b   : > { %v473_v61 = vadd.f32 %v1269_v25, %v470_v55  ;;  %v500_v8 = vadd.f32 %v1271_v26, %v497_v32  ;;  %v578_v56 = vadd.f32 %v577_v3, %v1250_v18  ;;  %v604_v16 = vstv %s1521_s17 }
  0x6c   : > { %v450_v9 = vadd.f32 %v1299_v37, %v447_v46  ;;  %v527_v10 = vadd.f32 %v1280_v30, %v524_v2  ;;  %v554_v49 = vadd.f32 %v1282_v31, %v551_v58  ;;  %v605_v20 = vadd.f32 %v604_v16, %v1252_v19  ;;  %v1689_v2 = vld [vmem:[#allocation14_spill] sm:$0xff] }
  0x6d   : > { %v476_v13 = vadd.f32 %v1310_v42, %v473_v61  ;;  %v503_v14 = vadd.f32 %v1312_v43, %v500_v8  ;;  %v581_v12 = vadd.f32 %v1291_v35, %v578_v56  ;;  %v631_v25 = vstv %s1531_s18  ;;  %v1688_v61 = vld [vmem:[#allocation17_spill] sm:$0xff] }
  0x6e   : > { %v453_v26 = vadd.f32 %v1340_v54, %v450_v9  ;;  %v530_v18 = vadd.f32 %v1321_v47, %v527_v10  ;;  %v557_v24 = vadd.f32 %v1323_v48, %v554_v49  ;;  %v608_v37 = vadd.f32 %v1293_v36, %v605_v20  ;;  %v1690_v45 = vld [vmem:[#allocation21_spill] sm:$0xff]  ;;  %v1691_v55 = vld [vmem:[#allocation22_spill] sm:$0xff]  ;;  %v1697_v10 = vld [vmem:[#allocation19_spill] sm:$0xff] }
  0x6f   : > { %v479_v30 = vadd.f32 %v1353_v59, %v476_v13  ;;  %v506_v31 = vadd.f32 %v1355_v60, %v503_v14  ;;  %v584_v19 = vadd.f32 %v1332_v52, %v581_v12  ;;  %v632_v42 = vadd.f32 %v631_v25, %v1262_v23  ;;  %v1694_v32 = vld [vmem:[#allocation23_spill] sm:$0xff]  ;;  %v1695_v46 = vld [vmem:[#allocation24_spill] sm:$0xff] }
  0x70   : > { %v456_v43 = vadd.f32 %v1384_v7, %v453_v26  ;;  %v533_v35 = vadd.f32 %v1364_v0, %v530_v18  ;;  %v560_v54 = vadd.f32 %v1366_v1, %v557_v24  ;;  %v611_v47 = vadd.f32 %v1334_v53, %v608_v37  ;;  %v1698_v20 = vld [vmem:[#allocation15_spill] sm:$0xff]  ;;  %v1700_v18 = vld [vmem:[#allocation25_spill] sm:$0xff]  ;;  %v1701_v37 = vld [vmem:[#allocation20_spill] sm:$0xff] }
  0x71   : > { %v482_v48 = vadd.f32 %v1398_v17, %v479_v30  ;;  %v509_v36 = vadd.f32 %v1401_v21, %v506_v31  ;;  %v587_v59 = vadd.f32 %v1375_v5, %v584_v19  ;;  %v635_v60 = vadd.f32 %v1303_v40, %v632_v42 }
  0x72   : > { %v459_v52 = vadd.f32 %v1434_v41, %v456_v43  ;;  %v536_v23 = vadd.f32 %v1411_v28, %v533_v35  ;;  %v563_v7 = vadd.f32 %v1414_v29, %v560_v54  ;;  %v614_v0 = vadd.f32 %v1377_v6, %v611_v47 }
  0x73   : > { %v485_v1 = vadd.f32 %v1449_v50, %v482_v48  ;;  %v512_v53 = vadd.f32 %v1452_v51, %v509_v36  ;;  %v590_v17 = vadd.f32 %v1424_v38, %v587_v59  ;;  %v638_v21 = vadd.f32 %v1344_v57, %v635_v60  ;;  %v1687_v57 = vld [vmem:[#allocation16_spill] sm:$0xff] }
  0x74   : > { %v462_v5 = vadd.f32 %v1485_v22, %v459_v52  ;;  %v539_v40 = vadd.f32 %v1462_v62, %v536_v23  ;;  %v566_v41 = vadd.f32 %v1465_v63, %v563_v7  ;;  %v617_v28 = vadd.f32 %v1427_v39, %v614_v0 }
  0x75   : > { %v488_v29 = vadd.f32 %v1500_v34, %v485_v1  ;;  %v515_v6 = vadd.f32 %v1503_v44, %v512_v53  ;;  %v593_v50 = vadd.f32 %v1475_v11, %v590_v17  ;;  %v641_v51 = vadd.f32 %v1388_v15, %v638_v21  ;;  %v1692_v34 = vld [vmem:[#allocation18_spill] sm:$0xff]  ;;  %v1693_v44 = vld [vmem:[#allocation12_spill] sm:$0xff] }
  0x76   : > { %v465_v38 = vadd.f32 %v1534_v27, %v462_v5  ;;  %v542_v22 = vadd.f32 %v1687_v57, %v539_v40  ;;  %v569_v62 = vadd.f32 %v1688_v61, %v566_v41  ;;  %v620_v63 = vadd.f32 %v1689_v2, %v617_v28  ;;  %v1702_v21 = vld [vmem:[#allocation10_spill] sm:$0xff]  ;;  %v1703_v40 = vld [vmem:[#allocation11_spill] sm:$0xff]  ;;  %v1704_v28 = vld [vmem:[#allocation13_spill] sm:$0xff] }
  0x77   : > { %v491_v39 = vadd.f32 %v1690_v45, %v488_v29  ;;  %v518_v3 = vadd.f32 %v1691_v55, %v515_v6  ;;  %v596_v4 = vadd.f32 %v1692_v34, %v593_v50  ;;  %v644_v16 = vadd.f32 %v1693_v44, %v641_v51 }
  0x78   : > { %v466_v11 = vmax.f32 %v465_v38, 0.0  ;;  %v545_v15 = vadd.f32 %v1694_v32, %v542_v22  ;;  %v572_v27 = vadd.f32 %v1695_v46, %v569_v62  ;;  %v1696_v58 = vstv %s1470_s28 }
  0x79   : > { %v625_v8 = vmul.f32 %v1497_v33, %v1696_v58  ;;  %v492_v56 = vmax.f32 %v491_v39, 0.0  ;;  %v519_v9 = vmax.f32 %v518_v3, 0.0  ;;  %v623_v49 = vadd.f32 %v1697_v10, %v620_v63 }
  0x7a   : > { %v647_v13 = vadd.f32 %v1698_v20, %v644_v16  ;;  %v1699_v14 = vstv %s1480_s30  ;;  %v546_v26 = vmax.f32 %v545_v15, 0.0  ;;  %v599_v24 = vadd.f32 %v1700_v18, %v596_v4 }
  0x7b   : > { %v652_v12 = vmul.f32 %v1497_v33, %v1699_v14  ;;  %v493_v25 = vadd.f32 %v492_v56, %v466_v11  ;;  %v573_v19 = vmax.f32 %v572_v27, 0.0  ;;  %v626_v42 = vadd.f32 %v625_v8, %v623_v49 }
  0x7c   : > { %v650_v30 = vadd.f32 %v1701_v37, %v647_v13  ;;  %v600_v35 = vmin.f32 %v599_v24, 0.0  ;;  %v656_v52 = vstv %s426_s19 }
  0x7d   : > { %v520_v31 = vadd.f32 %v519_v9, %v493_v25  ;;  %v627_v48 = vmax.f32 %v626_v42, 0.0 }
  0x7e   : > { %v653_v54 = vadd.f32 %v652_v12, %v650_v30 }
  0x7f   : > { %v547_v43 = vadd.f32 %v546_v26, %v520_v31 }
  0x80   : > { %v654_v59 = vmin.f32 %v653_v54, 0.0 }
  0x81   : > { %v574_v47 = vadd.f32 %v573_v19, %v547_v43 }
  0x83   : > { %v601_v36 = vadd.f32 %v600_v35, %v574_v47 }
  0x85   : > { %v628_v60 = vadd.f32 %v627_v48, %v601_v36 }
  0x87   : > { %v655_v23 = vadd.f32 %v654_v59, %v628_v60 }
  0x89   : > { %v657_v7 = vadd.f32 %v656_v52, %v655_v23 }
  0x8b   : > { %v900_v0 = vmul.f32 -1.442695, %v657_v7 }
  0x8d   : > { %964 = vpow2.f32 %v900_v0 }
  0x97   : > { %v965_v1 = vpop.eup %964 }
  0x98   : > { %v661_v53 = vadd.f32 1.0, %v965_v1 }
  0x9a   : > { %966 = vrcp.f32 %v661_v53 }
  0xa4   : > { %v967_v17 = vpop.eup %966 }
  0xa5   : > { %v664_v5 = vmul.f32 %v967_v17, %v1702_v21  ;;  %v666_v41 = vmul.f32 %v967_v17, %v1703_v40  ;;  %v669_v29 = vmul.f32 %v967_v17, %v1704_v28  ;;  %v672_v6 = vmul.f32 %v967_v17, %v1497_v33 }
  0xa7   : > { %665 = vst [vmem:[%s353_s8] sm:$0x3] %v664_v5  ;;  %901 = vst [vmem:[%s353_s8 + $0x2] sm:$0x3] %v666_v41 }
  0xa8   : > { %902 = vst [vmem:[%s353_s8 + $0x4] sm:$0x3] %v669_v29  ;;  %903 = vst [vmem:[%s353_s8 + $0x6] sm:$0x3] %v672_v6 }
  0xa9 PF: > { %s19_s25 = sadd.s32 1, %s1043_s25   ;;  %s1705_s23 = smov %s1039_s24 }
  0xaa   : > { %p16_p5 = scmp.ge.s32.totalorder %s19_s25, 4   ;;  %s1706_s24 = smov %s1708_s7 }
  0xac   :  { %18 = sbr.rel (!%p16_p5) target bundleno = 5 (0x5), region = 99 }
  0xb3   :  { %702 = vsyncpa [#allocation4], 1 }
  0xb4   :  { %704 = vsyncpa [#allocation4 + $0x1], 1 }
  0xb5   :  { %705 = vsyncpa [#allocation6], 1 }

</bundles_post_ra>
